<compile_context>
chip_gen: v7x
topology: tpu7x:2x2x1
jax: 0.10.0
libtpu: 0.0.40
codegen_flags: <defaults>
</compile_context>

<pallas_src>
import jax
import jax.numpy as jnp
from jax.experimental import pallas as pl
from jax.experimental.pallas import tpu as pltpu

LANE = 128


def _round_up(x, m):
    return ((x + m - 1) // m) * m


def _default_num_core_splits():
    """2 on chips with two TensorCores per device (v4/v5p megacore, v7x), else 1."""
    try:
        kind = jax.devices()[0].device_kind.lower()
    except Exception:
        return 1
    if ("v4" in kind) or ("v5p" in kind) or ("7" in kind):
        return 2
    return 1


def _make_loss_kernel(threshold, tile_rows, steps, full_rows, rem, row_bound,
                      need_mask, zero_pad_mask, compute_dtype):
    # Python float: folds into the kernel as an immediate.  (A jnp scalar here
    # is a captured constant and fails tracing -- that was the previous bug.)
    thr = float(threshold)

    def accumulate(out_ref, v):
        # vreg-shaped accumulation: VPU adds only, no per-step cross-lane
        # reduce and no SMEM scalar round trip in the hot loop.
        out_ref[...] += jnp.sum(v.reshape(tile_rows // 8, 8, LANE), axis=0)

    def kernel(pred_ref, lab_ref, out_ref):
        c = pl.program_id(0)          # core-split ("parallel") axis
        i = pl.program_id(1)          # reduction ("arbitrary") axis

        @pl.when(i == 0)
        def _init():
            out_ref[...] = jnp.zeros_like(out_ref)

        # Hot path: cast in-registers (inputs may be bf16), abs-diff,
        # translated ReLU.  Pure VPU work, hidden under the input DMA.
        p = pred_ref[...].astype(compute_dtype)
        l = lab_ref[...].astype(compute_dtype)
        y = jnp.maximum(jnp.abs(p - l) - thr, 0.0).astype(jnp.float32)

        if not need_mask:
            accumulate(out_ref, y)
        else:
            row0 = (c * steps + i) * tile_rows

            @pl.when(row0 + tile_rows <= row_bound)
            def _fast():                      # steady state: zero mask work
                accumulate(out_ref, y)

            @pl.when(row0 + tile_rows > row_bound)
            def _edge():                      # only blocks overlapping the tail
                grow = row0 + jax.lax.broadcasted_iota(
                    jnp.int32, (tile_rows, LANE), 0)
                if zero_pad_mask:
                    # threshold < 0: zero-filled pad would contribute -thr.
                    valid = grow < full_rows
                    if rem:
                        lane = jax.lax.broadcasted_iota(
                            jnp.int32, (tile_rows, LANE), 1)
                        valid = valid | ((grow == full_rows) & (lane < rem))
                else:
                    # Only Pallas partial-edge-block garbage rows need zeroing.
                    valid = grow < row_bound
                accumulate(out_ref, jnp.where(valid, y, 0.0))

    return kernel


def translated_relu_loss(predictions, labels, threshold=0.25, k=1.0,
                         tile_rows=None, num_core_splits=None,
                         compute_in_bf16=False):
    """Pallas TPU implementation of k * mean(relu(|pred - lab| - threshold))."""
    assert predictions.shape == labels.shape
    n_elems = int(predictions.size)

    full_rows = n_elems // LANE              # rows that are entirely valid
    rem = n_elems % LANE                     # valid lanes in the partial row
    data_rows = pl.cdiv(n_elems, LANE)
    padded_rows = max(data_rows, 8)          # at least one (8, 128) vreg of rows
    pad = padded_rows * LANE - n_elems

    p_flat = predictions.reshape(-1)
    l_flat = labels.reshape(-1)
    if pad:
        # Rare path: only when n is not a multiple of 128 (or the input is
        # tiny).  Pads at most the sub-lane remainder / first vreg, never a
        # full block multiple, so the common case streams with zero copies.
        p_flat = jnp.pad(p_flat, (0, pad))
        l_flat = jnp.pad(l_flat, (0, pad))
    p2 = p_flat.reshape(padded_rows, LANE)   # free bitcast when pad == 0
    l2 = l_flat.reshape(padded_rows, LANE)

    if num_core_splits is None:
        num_core_splits = _default_num_core_splits()
    num_core_splits = max(1, min(num_core_splits, padded_rows // 8))

    if tile_rows is None:
        # ~2 MiB per input per block (x2 inputs x2 pipeline buffers = 8 MiB),
        # within every generation's default scoped VMEM (v5e's 16 MiB included).
        itemsize = max(predictions.dtype.itemsize, labels.dtype.itemsize)
        tile_rows = 8192 if itemsize <= 2 else 4096
    tile_rows = max(8, min(_round_up(tile_rows, 8),
                           _round_up(pl.cdiv(padded_rows, num_core_splits), 8),
                           (padded_rows // 8) * 8))

    nb = pl.cdiv(padded_rows, tile_rows)     # row-blocks containing data
    steps = pl.cdiv(nb, num_core_splits)
    covered_rows = num_core_splits * steps * tile_rows

    zero_pad_mask = (pad > 0) and (threshold < 0)   # zero pad contributes -thr
    need_mask = zero_pad_mask or (covered_rows > padded_rows)
    row_bound = full_rows if zero_pad_mask else padded_rows

    compute_dtype = (jnp.bfloat16
                     if (compute_in_bf16
                         and predictions.dtype == jnp.bfloat16
                         and labels.dtype == jnp.bfloat16)
                     else jnp.float32)

    kernel = _make_loss_kernel(threshold, tile_rows, steps, full_rows, rem,
                               row_bound, need_mask, zero_pad_mask,
                               compute_dtype)

    # Contiguous HBM stream per core split; the clamp keeps any trailing
    # out-of-range block index in bounds (its contribution is masked to 0).
    def block_map(c, i):
        return (jnp.minimum(c * steps + i, nb - 1), 0)

    out = pl.pallas_call(
        kernel,
        out_shape=jax.ShapeDtypeStruct((num_core_splits, 8, LANE), jnp.float32),
        grid_spec=pltpu.PrefetchScalarGridSpec(
            num_scalar_prefetch=0,
            grid=(num_core_splits, steps),
            in_specs=[
                pl.BlockSpec((tile_rows, LANE), block_map),
                pl.BlockSpec((tile_rows, LANE), block_map),
            ],
            # Each core split accumulates into its own (8, 128) partial-sum
            # slab; it is output-resident across the "arbitrary" axis, so no
            # VMEM scratch and no copy epilogue are needed.
            out_specs=pl.BlockSpec((None, 8, LANE), lambda c, i: (c, 0, 0)),
        ),
        compiler_params=pltpu.CompilerParams(
            dimension_semantics=("parallel", "arbitrary")),
    )(p2, l2)

    total = jnp.sum(out)                     # tiny: num_splits x 8 x 128
    return jnp.float32(float(k) / n_elems) * total


if __name__ == "__main__":
    key = jax.random.PRNGKey(0)
    k1, k2, k3, k4, k5, k6 = jax.random.split(key, 6)

    # NCHW prediction/label pair, size a multiple of 128 -> zero-copy fast path.
    p1 = jax.random.normal(k1, (2, 4, 16, 16), dtype=jnp.float32)
    l1 = jax.random.normal(k2, (2, 4, 16, 16), dtype=jnp.float32)
    loss1 = translated_relu_loss(p1, l1, threshold=0.25, k=1.0)
    jax.block_until_ready(loss1)
    ref1 = 1.0 * jnp.mean(jnp.maximum(jnp.abs(p1 - l1) - 0.25, 0.0))
    assert jnp.allclose(loss1, ref1, rtol=1e-4, atol=1e-6), (loss1, ref1)

    # Rows not a multiple of the tile -> exercises the partial-edge-block mask.
    p2 = jax.random.normal(k3, (3, 5, 16, 16), dtype=jnp.float32)
    l2 = jax.random.normal(k4, (3, 5, 16, 16), dtype=jnp.float32)
    loss2 = translated_relu_loss(p2, l2, threshold=0.5, k=3.0)
    jax.block_until_ready(loss2)
    ref2 = 3.0 * jnp.mean(jnp.maximum(jnp.abs(p2 - l2) - 0.5, 0.0))
    assert jnp.allclose(loss2, ref2, rtol=1e-4, atol=1e-6), (loss2, ref2)

    # Size not a multiple of 128 (sub-lane remainder), threshold >= 0.
    p3 = jax.random.normal(k5, (2, 3, 7, 11), dtype=jnp.float32)
    l3 = jax.random.normal(k6, (2, 3, 7, 11), dtype=jnp.float32)
    loss3 = translated_relu_loss(p3, l3, threshold=0.25, k=2.0)
    jax.block_until_ready(loss3)
    ref3 = 2.0 * jnp.mean(jnp.maximum(jnp.abs(p3 - l3) - 0.25, 0.0))
    assert jnp.allclose(loss3, ref3, rtol=1e-4, atol=1e-6), (loss3, ref3)

    # Negative threshold -> exercises the in-kernel lane/row zero-pad mask.
    loss4 = translated_relu_loss(p3, l3, threshold=-0.1, k=1.5)
    jax.block_until_ready(loss4)
    ref4 = 1.5 * jnp.mean(jnp.maximum(jnp.abs(p3 - l3) + 0.1, 0.0))
    assert jnp.allclose(loss4, ref4, rtol=1e-4, atol=1e-6), (loss4, ref4)

    print("KERNEL_OK")
</pallas_src>

<mosaic_0001>
module attributes {stable_mosaic.version = 11 : i64} {
  func.func @kernel(%arg0: i32, %arg1: i32, %arg2: memref<16x128xf32, #tpu.memory_space<vmem>>, %arg3: memref<16x128xf32, #tpu.memory_space<vmem>>, %arg4: memref<1x8x128xf32, #tpu.memory_space<vmem>>) attributes {dimension_semantics = [#tpu.dimension_semantics<parallel>, #tpu.dimension_semantics<arbitrary>], iteration_bounds = array<i64: 1, 1>, scalar_prefetch = 0 : i64, scratch_operands = 0 : i64, tpu.core_type = #tpu.core_type<tc>, window_params = [{transform_indices = @transform_0, window_bounds = array<i64: 16, 128>}, {transform_indices = @transform_1, window_bounds = array<i64: 16, 128>}, {transform_indices = @transform_2, window_bounds = array<i64: 1, 8, 128>}]} {
    %c0_i32 = arith.constant 0 : i32
    %0 = arith.cmpi eq, %arg1, %c0_i32 : i32
    %1 = arith.extui %0 : i1 to i32
    %c0_i32_0 = arith.constant 0 : i32
    %2 = arith.cmpi ne, %1, %c0_i32_0 : i32
    scf.if %2 {
      %cst_12 = arith.constant 0.000000e+00 : f32
      %19 = vector.broadcast %cst_12 : f32 to vector<8x128xf32>
      %c0_13 = arith.constant 0 : index
      %c0_14 = arith.constant 0 : index
      %c0_15 = arith.constant 0 : index
      %20 = vector.load %arg4[%c0_13, %c0_14, %c0_15] : memref<1x8x128xf32, #tpu.memory_space<vmem>>, vector<1x8x128xf32>
      %21 = vector.shape_cast %20 : vector<1x8x128xf32> to vector<8x128xf32>
      %22 = vector.shape_cast %19 : vector<8x128xf32> to vector<1x8x128xf32>
      tpu.vector_store %arg4[%c0_13, %c0_14, %c0_15], %22 {strides = array<i32>} : memref<1x8x128xf32, #tpu.memory_space<vmem>>, vector<1x8x128xf32>,
    } else {
    }
    %c0 = arith.constant 0 : index
    %c0_1 = arith.constant 0 : index
    %3 = vector.load %arg2[%c0, %c0_1] : memref<16x128xf32, #tpu.memory_space<vmem>>, vector<16x128xf32>
    %c0_2 = arith.constant 0 : index
    %c0_3 = arith.constant 0 : index
    %4 = vector.load %arg3[%c0_2, %c0_3] : memref<16x128xf32, #tpu.memory_space<vmem>>, vector<16x128xf32>
    %5 = arith.subf %3, %4 : vector<16x128xf32>
    %6 = math.absf %5 : vector<16x128xf32>
    %cst = arith.constant 2.500000e-01 : f32
    %7 = vector.broadcast %cst : f32 to vector<16x128xf32>
    %8 = arith.subf %6, %7 : vector<16x128xf32>
    %cst_4 = arith.constant 0.000000e+00 : f32
    %9 = vector.broadcast %cst_4 : f32 to vector<16x128xf32>
    %10 = arith.maximumf %8, %9 : vector<16x128xf32>
    %c0_5 = arith.constant 0 : index
    %c0_6 = arith.constant 0 : index
    %c0_7 = arith.constant 0 : index
    %11 = vector.load %arg4[%c0_5, %c0_6, %c0_7] : memref<1x8x128xf32, #tpu.memory_space<vmem>>, vector<1x8x128xf32>
    %12 = vector.shape_cast %11 : vector<1x8x128xf32> to vector<8x128xf32>
    %13 = vector.shape_cast %10 : vector<16x128xf32> to vector<2x8x128xf32>
    %cst_8 = arith.constant dense<0.000000e+00> : vector<8x128xf32>
    %14 = vector.multi_reduction <add>, %13, %cst_8 [0] : vector<2x8x128xf32> to vector<8x128xf32>
    %15 = arith.addf %12, %14 : vector<8x128xf32>
    %c0_9 = arith.constant 0 : index
    %c0_10 = arith.constant 0 : index
    %c0_11 = arith.constant 0 : index
    %16 = vector.load %arg4[%c0_9, %c0_10, %c0_11] : memref<1x8x128xf32, #tpu.memory_space<vmem>>, vector<1x8x128xf32>
    %17 = vector.shape_cast %16 : vector<1x8x128xf32> to vector<8x128xf32>
    %18 = vector.shape_cast %15 : vector<8x128xf32> to vector<1x8x128xf32>
    tpu.vector_store %arg4[%c0_9, %c0_10, %c0_11], %18 {strides = array<i32>} : memref<1x8x128xf32, #tpu.memory_space<vmem>>, vector<1x8x128xf32>,
    return
  }
  func.func @transform_0(%arg0: i32, %arg1: i32) -> (i32, i32) {
    %c1_i32 = arith.constant 1 : i32
    %0 = arith.muli %arg0, %c1_i32 : i32
    %1 = arith.addi %0, %arg1 : i32
    %c0_i32 = arith.constant 0 : i32
    %2 = arith.minsi %1, %c0_i32 : i32
    %c0_i32_0 = arith.constant 0 : i32
    %c0_i32_1 = arith.constant 0 : i32
    return %2, %c0_i32_0 : i32, i32
  }
  func.func @transform_1(%arg0: i32, %arg1: i32) -> (i32, i32) {
    %c1_i32 = arith.constant 1 : i32
    %0 = arith.muli %arg0, %c1_i32 : i32
    %1 = arith.addi %0, %arg1 : i32
    %c0_i32 = arith.constant 0 : i32
    %2 = arith.minsi %1, %c0_i32 : i32
    %c0_i32_0 = arith.constant 0 : i32
    %c0_i32_1 = arith.constant 0 : i32
    return %2, %c0_i32_0 : i32, i32
  }
  func.func @transform_2(%arg0: i32, %arg1: i32) -> (i32, i32, i32) {
    %c0_i32 = arith.constant 0 : i32
    %c0_i32_0 = arith.constant 0 : i32
    %c0_i32_1 = arith.constant 0 : i32
    return %arg0, %c0_i32, %c0_i32_0 : i32, i32, i32
  }
}

</mosaic_0001>

<bundles_post_ra>
// kernel: tpu_custom_call.1
= control target key start
LH: loop header
LB: loop body
LE: loop exit
PB: predicated region body
PF: predicated region fallthrough
CT: control target
= control target key end

     0   :  { %7 = vsyncpa [#allocation3], 0  ;;  %s237_s0 = inlined_call_operand.hbm [shape: f32[16,128], index: 0, kind: input, shape index: {}]   ;;  %s238_s1 = inlined_call_operand.hbm [shape: f32[16,128], index: 1, kind: input, shape index: {}]   ;;  %s239_s2 = inlined_call_operand.hbm [shape: f32[1,8,128], index: 2, kind: output, shape index: {}]  }
   0x1   :  { %8 = vsyncpa [#allocation6], 0 }
   0x2   :  { %9 = vsyncpa [#allocation4], 0  ;;  %s181_s9 = smov [#allocation2]   ;;  %s109_s13 = scalar_lea.hbm %s237_s0, 256 }
   0x3   :  { %s21_s10 = sshll.u32 %s181_s9, 4  ;;  %p110_p0 = scmp.ne.s32.totalorder %s237_s0, %s109_s13  ;;  %s22_s10 = int_to_ptr.vmem [resolvable:$true] %s21_s10 }
   0x4   :  { %p113_p1 = scmp.lt.u32.totalorder %s109_s13, %s237_s0 }
   0x6   :  { %p115_p2 = pnand %p113_p1, %p110_p0 }
   0x8   :  { %118 = shalt.err (!%p115_p2)
}
   0x9   :  { %s119_s18 = scalar_lea.vmem %s22_s10, 256  ;;  %p124_p4 = scmp.lt.s32.totalorder %s22_s10, %s22_s10 }
   0xa   :  { %p120_p3 = scmp.ne.s32.totalorder %s22_s10, %s119_s18  ;;  %p125_p5 = scmp.lt.s32.totalorder %s119_s18, %s119_s18 }
   0xc   :  { %p126_p6 = por %p125_p5, %p124_p4 }
   0xe   :  { %p127_p7 = pnand %p126_p6, %p120_p3 }
  0x10   :  { %130 = shalt.err (!%p127_p7)
}
  0x11   :  { %s182_s19 = smov 128   ;;  %s183_s20 = smov 8  }
  0x12   :  { %27 = dma.hbm_to_vmem [thread:$0]  %s237_s0, 256, %s22_s10, [#allocation3], %s182_s19, %s182_s19, %s183_s20  }
  0x13   :  { %s184_s23 = smov [#allocation5]   ;;  %s131_s27 = scalar_lea.hbm %s238_s1, 256 }
  0x14   :  { %s39_s24 = sshll.u32 %s184_s23, 4  ;;  %p132_p8 = scmp.ne.s32.totalorder %s238_s1, %s131_s27  ;;  %s40_s24 = int_to_ptr.vmem [resolvable:$true] %s39_s24 }
  0x15   :  { %p135_p9 = scmp.lt.u32.totalorder %s131_s27, %s238_s1 }
  0x17   :  { %p137_p10 = pnand %p135_p9, %p132_p8 }
  0x19   :  { %140 = shalt.err (!%p137_p10)
}
  0x1a   :  { %s141_s4 = scalar_lea.vmem %s40_s24, 256  ;;  %p146_p12 = scmp.lt.s32.totalorder %s40_s24, %s40_s24 }
  0x1b   :  { %p142_p11 = scmp.ne.s32.totalorder %s40_s24, %s141_s4  ;;  %p147_p13 = scmp.lt.s32.totalorder %s141_s4, %s141_s4 }
  0x1d   :  { %p148_p0 = por %p147_p13, %p146_p12 }
  0x1f   :  { %p149_p1 = pnand %p148_p0, %p142_p11 }
  0x21   :  { %152 = shalt.err (!%p149_p1)
}
  0x22   :  { %45 = dma.hbm_to_vmem [thread:$0]  %s238_s1, 256, %s40_s24, [#allocation6], %s182_s19, %s182_s19, %s183_s20  }
  0x23   :  { %175 = dma.done.wait [#allocation3], 256  }
  0x24   :  { %176 = vsyncadd [#allocation3], 4294967040 }
  0x25   :  { %177 = dma.done.wait [#allocation6], 256  }
  0x26   :  { %178 = vsyncadd [#allocation6], 4294967040  ;;  %v65_v0 = vld [vmem:[#allocation2] sm:$0xff]  ;;  %v66_v1 = vld [vmem:[#allocation2 + $0x8] sm:$0xff]  ;;  %s185_s6 = smov [#allocation7]  }
  0x27   :  { %v67_v2 = vld [vmem:[#allocation5] sm:$0xff]  ;;  %v68_v3 = vld [vmem:[#allocation5 + $0x8] sm:$0xff]  ;;  %s87_s7 = sshll.u32 %s185_s6, 4  ;;  %s88_s7 = int_to_ptr.vmem [resolvable:$true] %s87_s7 }
  0x28   :  { %v69_v4 = vsub.f32 %v65_v0, %v67_v2  ;;  %v70_v5 = vsub.f32 %v66_v1, %v68_v3  ;;  %s153_s1 = scalar_lea.vmem %s88_s7, 128  ;;  %p158_p3 = scmp.lt.s32.totalorder %s88_s7, %s88_s7 }
  0x29   :  { %p154_p2 = scmp.ne.s32.totalorder %s88_s7, %s153_s1  ;;  %p159_p4 = scmp.lt.s32.totalorder %s153_s1, %s153_s1 }
  0x2a   :  { %v71_v6 = vand.u32 2147483647, %v69_v4  ;;  %v72_v7 = vand.u32 2147483647, %v70_v5 }
  0x2b   :  { %p160_p5 = por %p159_p4, %p158_p3 }
  0x2c   :  { %v101_v8 = vadd.f32 -0.25, %v71_v6  ;;  %v102_v9 = vadd.f32 -0.25, %v72_v7 }
  0x2d   :  { %p161_p6 = pnand %p160_p5, %p154_p2 }
  0x2e   :  { %v75_v10 = vmax.f32 %v101_v8, 0.0  ;;  %v76_v11 = vmax.f32 %v102_v9, 0.0 }
  0x30   :  { %v78_v12 = vadd.f32 %v76_v11, %v75_v10 }
  0x32   :  { %80 = vst [vmem:[#allocation7] sm:$0xff] %v78_v12 }
  0x33   :  { %164 = shalt.err (!%p161_p6)
}
  0x34   :  { %s165_s10 = scalar_lea.hbm %s239_s2, 128 }
  0x35   :  { %p166_p7 = scmp.ne.s32.totalorder %s239_s2, %s165_s10  ;;  %p169_p8 = scmp.lt.u32.totalorder %s165_s10, %s239_s2 }
  0x37   :  { %p171_p9 = pnand %p169_p8, %p166_p7 }
  0x39   :  { %174 = shalt.err (!%p171_p9)
}
  0x3a   :  { %90 = dma.vmem_to_hbm [thread:$0]  %s88_s7, 128, %s239_s2, [#allocation4]  }
  0x3b   :  { %179 = dma.done.wait [#allocation4], 128  }
  0x3c   :  { %180 = vsyncadd [#allocation4], 4294967168 }
  0x3d   :  { %94 = vsyncpa [#allocation3], 1 }
  0x3e   :  { %95 = vsyncpa [#allocation6], 1 }
  0x3f   :  { %96 = vsyncpa [#allocation4], 1 }

</bundles_post_ra>
